<compile_context>
chip_gen: v6e
topology: v6e:2x2x1
jax: 0.10.0
libtpu: 0.0.40
codegen_flags: <defaults>
</compile_context>

<pallas_src>
import functools

import jax
import jax.numpy as jnp
from jax.experimental import pallas as pl
from jax.experimental.pallas import tpu as pltpu


def _gru_gates(x_c, h_c, h_prev_f32, wi_r, wi_z, wi_n, wh_r, wh_z, wh_n,
               b_r, b_z, b_in, b_hn):
    """PyTorch GRUCell math with per-gate (lane-aligned) matmuls, f32 accumulation."""
    gi_r = jnp.dot(x_c, wi_r, preferred_element_type=jnp.float32)
    gi_z = jnp.dot(x_c, wi_z, preferred_element_type=jnp.float32)
    gi_n = jnp.dot(x_c, wi_n, preferred_element_type=jnp.float32)
    gh_r = jnp.dot(h_c, wh_r, preferred_element_type=jnp.float32)
    gh_z = jnp.dot(h_c, wh_z, preferred_element_type=jnp.float32)
    gh_n = jnp.dot(h_c, wh_n, preferred_element_type=jnp.float32)
    r = jax.nn.sigmoid(gi_r + gh_r + b_r)
    z = jax.nn.sigmoid(gi_z + gh_z + b_z)
    n = jnp.tanh(gi_n + b_in + r * (gh_n + b_hn))
    return (1.0 - z) * n + z * h_prev_f32


def _stacked_gru_fused_kernel(x_ref, h_ref, w_i_ref, w_h_ref, b_ref, h_out_ref):
    """Single invocation, all layers resident in VMEM, unrolled static layer loop."""
    num_layers = h_ref.shape[0]
    w_dtype = w_i_ref.dtype
    x = x_ref[...].astype(jnp.float32)
    for l in range(num_layers):          # static unroll: all ref indices below are views
        h_prev = h_ref[l].astype(jnp.float32)
        h_new = _gru_gates(
            x.astype(w_dtype), h_prev.astype(w_dtype), h_prev,
            w_i_ref[l, 0], w_i_ref[l, 1], w_i_ref[l, 2],
            w_h_ref[l, 0], w_h_ref[l, 1], w_h_ref[l, 2],
            b_ref[l, 0], b_ref[l, 1], b_ref[l, 2], b_ref[l, 3])
        h_out_ref[l] = h_new.astype(h_out_ref.dtype)
        x = h_new                         # dropout == identity (eval mode)


def _stacked_gru_grid_kernel(x_ref, h_ref, w_i_ref, w_h_ref, b_ref,
                             h_out_ref, carry_ref):
    """Fallback: one grid step == one layer (sequential 'arbitrary' axis)."""
    i = pl.program_id(0)

    @pl.when(i == 0)
    def _():
        carry_ref[...] = x_ref[...].astype(jnp.float32)

    w_dtype = w_i_ref.dtype
    x = carry_ref[...]                          # [B, H] f32 carried output of prev layer
    h_prev = h_ref[0].astype(jnp.float32)       # [B, H]
    h_new = _gru_gates(
        x.astype(w_dtype), h_prev.astype(w_dtype), h_prev,
        w_i_ref[0, 0], w_i_ref[0, 1], w_i_ref[0, 2],
        w_h_ref[0, 0], w_h_ref[0, 1], w_h_ref[0, 2],
        b_ref[0, 0], b_ref[0, 1], b_ref[0, 2], b_ref[0, 3])
    h_out_ref[0] = h_new.astype(h_out_ref.dtype)
    carry_ref[...] = h_new                      # feeds next layer (dropout == identity)


def _pack_params(w_ih, w_hh, b_ih, b_hh, hidden, weight_dtype):
    """Pre-transpose + per-gate split the weights, pre-combine biases (XLA side)."""
    L, _, in_sz = w_ih.shape
    # [L, 3H, in] -> [L, 3, H, in] -> [L, 3, in, H]  (gate order r, z, n preserved)
    w_i = w_ih.reshape(L, 3, hidden, in_sz).transpose(0, 1, 3, 2)
    w_h = w_hh.reshape(L, 3, hidden, hidden).transpose(0, 1, 3, 2)
    if weight_dtype is not None:
        w_i = w_i.astype(weight_dtype)
        w_h = w_h.astype(weight_dtype)
    b_i = b_ih.reshape(L, 3, 1, hidden).astype(jnp.float32)
    b_h = b_hh.reshape(L, 3, 1, hidden).astype(jnp.float32)
    # [L, 4, 1, H]: (b_r = b_ih_r + b_hh_r, b_z = b_ih_z + b_hh_z, b_in, b_hn)
    b_all = jnp.concatenate(
        [b_i[:, 0:1] + b_h[:, 0:1], b_i[:, 1:2] + b_h[:, 1:2],
         b_i[:, 2:3], b_h[:, 2:3]], axis=1)
    return w_i, w_h, b_all


@functools.partial(
    jax.jit, static_argnames=("weight_dtype", "vmem_budget_bytes", "force_grid"))
def stacked_gru_cell(x, h, w_ih, w_hh, b_ih, b_hh, *, weight_dtype=None,
                     vmem_budget_bytes=64 * 1024 * 1024, force_grid=False):
    """Forward pass of StackedGRUCell (eval mode).

    x: [B, in], h: [L, B, H], w_ih: [L, 3H, in], w_hh: [L, 3H, H], b_ih/b_hh: [L, 3H].
    Returns (last_h [B, H], h_all [L, B, H]).
    """
    L, B, H = h.shape
    in_sz = x.shape[1]
    assert in_sz == H, "stacked per-layer weights require input_size == rnn_size"
    assert w_ih.shape == (L, 3 * H, in_sz) and w_hh.shape == (L, 3 * H, H)

    w_i, w_h, b_all = _pack_params(w_ih, w_hh, b_ih, b_hh, H, weight_dtype)

    w_bytes = w_i.size * w_i.dtype.itemsize + w_h.size * w_h.dtype.itemsize
    act_bytes = (x.size + 2 * h.size + b_all.size) * 4
    fused_est = 2 * (w_bytes + act_bytes) + (4 << 20)   # x2 buffering, 4 MiB slack
    use_fused = (not force_grid) and fused_est <= vmem_budget_bytes

    if use_fused:
        vmem_limit = int(min(vmem_budget_bytes, max(32 << 20, fused_est)))
        h_all = pl.pallas_call(
            _stacked_gru_fused_kernel,
            out_shape=jax.ShapeDtypeStruct((L, B, H), x.dtype),
            compiler_params=pltpu.CompilerParams(vmem_limit_bytes=vmem_limit),
        )(x, h, w_i, w_h, b_all)
    else:
        per_layer_est = 2 * ((w_bytes + act_bytes) // L) + (4 << 20)
        vmem_limit = int(min(vmem_budget_bytes, max(32 << 20, per_layer_est)))
        h_all = pl.pallas_call(
            _stacked_gru_grid_kernel,
            out_shape=jax.ShapeDtypeStruct((L, B, H), x.dtype),
            grid_spec=pltpu.PrefetchScalarGridSpec(
                num_scalar_prefetch=0,
                grid=(L,),
                in_specs=[
                    pl.BlockSpec((B, in_sz), lambda i: (0, 0)),              # x (resident)
                    pl.BlockSpec((1, B, H), lambda i: (i, 0, 0)),            # h[i]
                    pl.BlockSpec((1, 3, in_sz, H), lambda i: (i, 0, 0, 0)),  # w_i[i]
                    pl.BlockSpec((1, 3, H, H), lambda i: (i, 0, 0, 0)),      # w_h[i]
                    pl.BlockSpec((1, 4, 1, H), lambda i: (i, 0, 0, 0)),      # biases[i]
                ],
                out_specs=pl.BlockSpec((1, B, H), lambda i: (i, 0, 0)),      # h_all[i]
                scratch_shapes=[pltpu.VMEM((B, H), jnp.float32)],            # layer carry
            ),
            compiler_params=pltpu.CompilerParams(
                dimension_semantics=("arbitrary",),   # layers are sequentially dependent
                vmem_limit_bytes=vmem_limit),
        )(x, h, w_i, w_h, b_all)

    last_h = h_all[-1]
    return last_h, h_all


def stacked_gru_cell_ref(x, h, w_ih, w_hh, b_ih, b_hh):
    """Pure-JAX reference (PyTorch GRUCell semantics)."""
    L, _, H = h.shape
    h_list = []
    for i in range(L):
        gi = x @ w_ih[i].T + b_ih[i]
        gh = h[i] @ w_hh[i].T + b_hh[i]
        r = jax.nn.sigmoid(gi[:, 0:H] + gh[:, 0:H])
        z = jax.nn.sigmoid(gi[:, H:2 * H] + gh[:, H:2 * H])
        n = jnp.tanh(gi[:, 2 * H:3 * H] + r * gh[:, 2 * H:3 * H])
        h_i = (1.0 - z) * n + z * h[i]
        x = h_i  # dropout == identity (eval)
        h_list.append(h_i)
    return h_list[-1], jnp.stack(h_list)


if __name__ == "__main__":
    num_layers = 2
    batch = 2
    hidden = 32
    input_size = hidden  # required for stacked per-layer weights

    key = jax.random.PRNGKey(0)
    kx, kh, k1, k2, k3, k4 = jax.random.split(key, 6)

    x = jax.random.normal(kx, (batch, input_size), jnp.float32)
    h = jax.random.normal(kh, (num_layers, batch, hidden), jnp.float32)

    # PyTorch GRUCell init: uniform(-1/sqrt(hidden), 1/sqrt(hidden))
    bound = 1.0 / float(jnp.sqrt(jnp.float32(hidden)))
    w_ih = jax.random.uniform(k1, (num_layers, 3 * hidden, input_size),
                              jnp.float32, -bound, bound)
    w_hh = jax.random.uniform(k2, (num_layers, 3 * hidden, hidden),
                              jnp.float32, -bound, bound)
    b_ih = jax.random.uniform(k3, (num_layers, 3 * hidden),
                              jnp.float32, -bound, bound)
    b_hh = jax.random.uniform(k4, (num_layers, 3 * hidden),
                              jnp.float32, -bound, bound)

    last_ref, all_ref = stacked_gru_cell_ref(x, h, w_ih, w_hh, b_ih, b_hh)

    # 1) Fused path (all layers in one grid-less pallas_call, f32 weights).
    last_h, h_all = stacked_gru_cell(x, h, w_ih, w_hh, b_ih, b_hh)
    jax.block_until_ready((last_h, h_all))
    assert last_h.shape == (batch, hidden)
    assert h_all.shape == (num_layers, batch, hidden)
    assert jnp.allclose(last_h, last_ref, atol=1e-4, rtol=1e-4)
    assert jnp.allclose(h_all, all_ref, atol=1e-4, rtol=1e-4)

    # 2) Grid fallback path (sequential layer grid, per-layer weight blocks).
    last_g, all_g = stacked_gru_cell(x, h, w_ih, w_hh, b_ih, b_hh, force_grid=True)
    jax.block_until_ready((last_g, all_g))
    assert jnp.allclose(last_g, last_ref, atol=1e-4, rtol=1e-4)
    assert jnp.allclose(all_g, all_ref, atol=1e-4, rtol=1e-4)

    # 3) Fused path with bf16 weight streaming (f32 accumulation).
    last_b, all_b = stacked_gru_cell(x, h, w_ih, w_hh, b_ih, b_hh,
                                     weight_dtype=jnp.bfloat16)
    jax.block_until_ready((last_b, all_b))
    w_ih_b = w_ih.astype(jnp.bfloat16).astype(jnp.float32)
    w_hh_b = w_hh.astype(jnp.bfloat16).astype(jnp.float32)
    last_ref_b, all_ref_b = stacked_gru_cell_ref(x, h, w_ih_b, w_hh_b, b_ih, b_hh)
    assert jnp.allclose(last_b, last_ref_b, atol=5e-2, rtol=5e-2)
    assert jnp.allclose(all_b, all_ref_b, atol=5e-2, rtol=5e-2)

    print("KERNEL_OK")
</pallas_src>

<mosaic_0001>
module attributes {stable_mosaic.version = 11 : i64} {
  func.func @_stacked_gru_fused_kernel(%arg0: memref<2x32xf32, #tpu.memory_space<vmem>>, %arg1: memref<2x2x32xf32, #tpu.memory_space<vmem>>, %arg2: memref<2x3x32x32xf32, #tpu.memory_space<vmem>>, %arg3: memref<2x3x32x32xf32, #tpu.memory_space<vmem>>, %arg4: memref<2x4x1x32xf32, #tpu.memory_space<vmem>>, %arg5: memref<2x2x32xf32, #tpu.memory_space<vmem>>) attributes {dimension_semantics = [], scalar_prefetch = 0 : i64, scratch_operands = 0 : i64, tpu.core_type = #tpu.core_type<tc>} {
    %c0 = arith.constant 0 : index
    %c0_0 = arith.constant 0 : index
    %0 = vector.load %arg0[%c0, %c0_0] : memref<2x32xf32, #tpu.memory_space<vmem>>, vector<2x32xf32>
    %c0_1 = arith.constant 0 : index
    %c0_2 = arith.constant 0 : index
    %c0_3 = arith.constant 0 : index
    %1 = vector.load %arg1[%c0_1, %c0_2, %c0_3] : memref<2x2x32xf32, #tpu.memory_space<vmem>>, vector<1x2x32xf32>
    %2 = vector.shape_cast %1 : vector<1x2x32xf32> to vector<2x32xf32>
    %c0_4 = arith.constant 0 : index
    %c0_5 = arith.constant 0 : index
    %c0_6 = arith.constant 0 : index
    %c0_7 = arith.constant 0 : index
    %3 = vector.load %arg2[%c0_4, %c0_5, %c0_6, %c0_7] : memref<2x3x32x32xf32, #tpu.memory_space<vmem>>, vector<1x1x32x32xf32>
    %4 = vector.shape_cast %3 : vector<1x1x32x32xf32> to vector<32x32xf32>
    %c0_8 = arith.constant 0 : index
    %c1 = arith.constant 1 : index
    %c0_9 = arith.constant 0 : index
    %c0_10 = arith.constant 0 : index
    %5 = vector.load %arg2[%c0_8, %c1, %c0_9, %c0_10] : memref<2x3x32x32xf32, #tpu.memory_space<vmem>>, vector<1x1x32x32xf32>
    %6 = vector.shape_cast %5 : vector<1x1x32x32xf32> to vector<32x32xf32>
    %c0_11 = arith.constant 0 : index
    %c2 = arith.constant 2 : index
    %c0_12 = arith.constant 0 : index
    %c0_13 = arith.constant 0 : index
    %7 = vector.load %arg2[%c0_11, %c2, %c0_12, %c0_13] : memref<2x3x32x32xf32, #tpu.memory_space<vmem>>, vector<1x1x32x32xf32>
    %8 = vector.shape_cast %7 : vector<1x1x32x32xf32> to vector<32x32xf32>
    %c0_14 = arith.constant 0 : index
    %c0_15 = arith.constant 0 : index
    %c0_16 = arith.constant 0 : index
    %c0_17 = arith.constant 0 : index
    %9 = vector.load %arg3[%c0_14, %c0_15, %c0_16, %c0_17] : memref<2x3x32x32xf32, #tpu.memory_space<vmem>>, vector<1x1x32x32xf32>
    %10 = vector.shape_cast %9 : vector<1x1x32x32xf32> to vector<32x32xf32>
    %c0_18 = arith.constant 0 : index
    %c1_19 = arith.constant 1 : index
    %c0_20 = arith.constant 0 : index
    %c0_21 = arith.constant 0 : index
    %11 = vector.load %arg3[%c0_18, %c1_19, %c0_20, %c0_21] : memref<2x3x32x32xf32, #tpu.memory_space<vmem>>, vector<1x1x32x32xf32>
    %12 = vector.shape_cast %11 : vector<1x1x32x32xf32> to vector<32x32xf32>
    %c0_22 = arith.constant 0 : index
    %c2_23 = arith.constant 2 : index
    %c0_24 = arith.constant 0 : index
    %c0_25 = arith.constant 0 : index
    %13 = vector.load %arg3[%c0_22, %c2_23, %c0_24, %c0_25] : memref<2x3x32x32xf32, #tpu.memory_space<vmem>>, vector<1x1x32x32xf32>
    %14 = vector.shape_cast %13 : vector<1x1x32x32xf32> to vector<32x32xf32>
    %c0_26 = arith.constant 0 : index
    %c0_27 = arith.constant 0 : index
    %c0_28 = arith.constant 0 : index
    %c0_29 = arith.constant 0 : index
    %15 = vector.load %arg4[%c0_26, %c0_27, %c0_28, %c0_29] : memref<2x4x1x32xf32, #tpu.memory_space<vmem>>, vector<1x1x1x32xf32>
    %16 = vector.shape_cast %15 : vector<1x1x1x32xf32> to vector<1x32xf32>
    %c0_30 = arith.constant 0 : index
    %c1_31 = arith.constant 1 : index
    %c0_32 = arith.constant 0 : index
    %c0_33 = arith.constant 0 : index
    %17 = vector.load %arg4[%c0_30, %c1_31, %c0_32, %c0_33] : memref<2x4x1x32xf32, #tpu.memory_space<vmem>>, vector<1x1x1x32xf32>
    %18 = vector.shape_cast %17 : vector<1x1x1x32xf32> to vector<1x32xf32>
    %c0_34 = arith.constant 0 : index
    %c2_35 = arith.constant 2 : index
    %c0_36 = arith.constant 0 : index
    %c0_37 = arith.constant 0 : index
    %19 = vector.load %arg4[%c0_34, %c2_35, %c0_36, %c0_37] : memref<2x4x1x32xf32, #tpu.memory_space<vmem>>, vector<1x1x1x32xf32>
    %20 = vector.shape_cast %19 : vector<1x1x1x32xf32> to vector<1x32xf32>
    %c0_38 = arith.constant 0 : index
    %c3 = arith.constant 3 : index
    %c0_39 = arith.constant 0 : index
    %c0_40 = arith.constant 0 : index
    %21 = vector.load %arg4[%c0_38, %c3, %c0_39, %c0_40] : memref<2x4x1x32xf32, #tpu.memory_space<vmem>>, vector<1x1x1x32xf32>
    %22 = vector.shape_cast %21 : vector<1x1x1x32xf32> to vector<1x32xf32>
    %cst = arith.constant dense<0.000000e+00> : vector<2x32xf32>
    %23 = tpu.matmul %0, %4, %cst {dimension_numbers = #tpu.dot_dimension_numbers<[1], [0], [0], [1], [0, 0, 1, 1], [], []>} : vector<2x32xf32>, vector<32x32xf32>, vector<2x32xf32> -> vector<2x32xf32>
    %cst_41 = arith.constant dense<0.000000e+00> : vector<2x32xf32>
    %24 = tpu.matmul %0, %6, %cst_41 {dimension_numbers = #tpu.dot_dimension_numbers<[1], [0], [0], [1], [0, 0, 1, 1], [], []>} : vector<2x32xf32>, vector<32x32xf32>, vector<2x32xf32> -> vector<2x32xf32>
    %cst_42 = arith.constant dense<0.000000e+00> : vector<2x32xf32>
    %25 = tpu.matmul %0, %8, %cst_42 {dimension_numbers = #tpu.dot_dimension_numbers<[1], [0], [0], [1], [0, 0, 1, 1], [], []>} : vector<2x32xf32>, vector<32x32xf32>, vector<2x32xf32> -> vector<2x32xf32>
    %cst_43 = arith.constant dense<0.000000e+00> : vector<2x32xf32>
    %26 = tpu.matmul %2, %10, %cst_43 {dimension_numbers = #tpu.dot_dimension_numbers<[1], [0], [0], [1], [0, 0, 1, 1], [], []>} : vector<2x32xf32>, vector<32x32xf32>, vector<2x32xf32> -> vector<2x32xf32>
    %cst_44 = arith.constant dense<0.000000e+00> : vector<2x32xf32>
    %27 = tpu.matmul %2, %12, %cst_44 {dimension_numbers = #tpu.dot_dimension_numbers<[1], [0], [0], [1], [0, 0, 1, 1], [], []>} : vector<2x32xf32>, vector<32x32xf32>, vector<2x32xf32> -> vector<2x32xf32>
    %cst_45 = arith.constant dense<0.000000e+00> : vector<2x32xf32>
    %28 = tpu.matmul %2, %14, %cst_45 {dimension_numbers = #tpu.dot_dimension_numbers<[1], [0], [0], [1], [0, 0, 1, 1], [], []>} : vector<2x32xf32>, vector<32x32xf32>, vector<2x32xf32> -> vector<2x32xf32>
    %29 = arith.addf %23, %26 : vector<2x32xf32>
    %30 = vector.broadcast %16 : vector<1x32xf32> to vector<2x32xf32>
    %31 = arith.addf %29, %30 : vector<2x32xf32>
    %32 = arith.negf %31 : vector<2x32xf32>
    %33 = math.exp %32 : vector<2x32xf32>
    %cst_46 = arith.constant 1.000000e+00 : f32
    %34 = vector.broadcast %cst_46 : f32 to vector<2x32xf32>
    %35 = arith.addf %34, %33 : vector<2x32xf32>
    %36 = arith.divf %34, %35 : vector<2x32xf32>
    %37 = arith.addf %24, %27 : vector<2x32xf32>
    %38 = vector.broadcast %18 : vector<1x32xf32> to vector<2x32xf32>
    %39 = arith.addf %37, %38 : vector<2x32xf32>
    %40 = arith.negf %39 : vector<2x32xf32>
    %41 = math.exp %40 : vector<2x32xf32>
    %cst_47 = arith.constant 1.000000e+00 : f32
    %42 = vector.broadcast %cst_47 : f32 to vector<2x32xf32>
    %43 = arith.addf %42, %41 : vector<2x32xf32>
    %44 = arith.divf %42, %43 : vector<2x32xf32>
    %45 = vector.broadcast %20 : vector<1x32xf32> to vector<2x32xf32>
    %46 = arith.addf %25, %45 : vector<2x32xf32>
    %47 = vector.broadcast %22 : vector<1x32xf32> to vector<2x32xf32>
    %48 = arith.addf %28, %47 : vector<2x32xf32>
    %49 = arith.mulf %36, %48 : vector<2x32xf32>
    %50 = arith.addf %46, %49 : vector<2x32xf32>
    %51 = math.tanh %50 : vector<2x32xf32>
    %cst_48 = arith.constant 1.000000e+00 : f32
    %52 = vector.broadcast %cst_48 : f32 to vector<2x32xf32>
    %53 = arith.subf %52, %44 : vector<2x32xf32>
    %54 = arith.mulf %53, %51 : vector<2x32xf32>
    %55 = arith.mulf %44, %2 : vector<2x32xf32>
    %56 = arith.addf %54, %55 : vector<2x32xf32>
    %c0_49 = arith.constant 0 : index
    %c0_50 = arith.constant 0 : index
    %c0_51 = arith.constant 0 : index
    %57 = vector.load %arg5[%c0_49, %c0_50, %c0_51] : memref<2x2x32xf32, #tpu.memory_space<vmem>>, vector<1x2x32xf32>
    %58 = vector.shape_cast %57 : vector<1x2x32xf32> to vector<2x32xf32>
    %59 = vector.shape_cast %56 : vector<2x32xf32> to vector<1x2x32xf32>
    tpu.vector_store %arg5[%c0_49, %c0_50, %c0_51], %59 {strides = array<i32>} : memref<2x2x32xf32, #tpu.memory_space<vmem>>, vector<1x2x32xf32>,
    %c1_52 = arith.constant 1 : index
    %c0_53 = arith.constant 0 : index
    %c0_54 = arith.constant 0 : index
    %60 = vector.load %arg1[%c1_52, %c0_53, %c0_54] : memref<2x2x32xf32, #tpu.memory_space<vmem>>, vector<1x2x32xf32>
    %61 = vector.shape_cast %60 : vector<1x2x32xf32> to vector<2x32xf32>
    %c1_55 = arith.constant 1 : index
    %c0_56 = arith.constant 0 : index
    %c0_57 = arith.constant 0 : index
    %c0_58 = arith.constant 0 : index
    %62 = vector.load %arg2[%c1_55, %c0_56, %c0_57, %c0_58] : memref<2x3x32x32xf32, #tpu.memory_space<vmem>>, vector<1x1x32x32xf32>
    %63 = vector.shape_cast %62 : vector<1x1x32x32xf32> to vector<32x32xf32>
    %c1_59 = arith.constant 1 : index
    %c1_60 = arith.constant 1 : index
    %c0_61 = arith.constant 0 : index
    %c0_62 = arith.constant 0 : index
    %64 = vector.load %arg2[%c1_59, %c1_60, %c0_61, %c0_62] : memref<2x3x32x32xf32, #tpu.memory_space<vmem>>, vector<1x1x32x32xf32>
    %65 = vector.shape_cast %64 : vector<1x1x32x32xf32> to vector<32x32xf32>
    %c1_63 = arith.constant 1 : index
    %c2_64 = arith.constant 2 : index
    %c0_65 = arith.constant 0 : index
    %c0_66 = arith.constant 0 : index
    %66 = vector.load %arg2[%c1_63, %c2_64, %c0_65, %c0_66] : memref<2x3x32x32xf32, #tpu.memory_space<vmem>>, vector<1x1x32x32xf32>
    %67 = vector.shape_cast %66 : vector<1x1x32x32xf32> to vector<32x32xf32>
    %c1_67 = arith.constant 1 : index
    %c0_68 = arith.constant 0 : index
    %c0_69 = arith.constant 0 : index
    %c0_70 = arith.constant 0 : index
    %68 = vector.load %arg3[%c1_67, %c0_68, %c0_69, %c0_70] : memref<2x3x32x32xf32, #tpu.memory_space<vmem>>, vector<1x1x32x32xf32>
    %69 = vector.shape_cast %68 : vector<1x1x32x32xf32> to vector<32x32xf32>
    %c1_71 = arith.constant 1 : index
    %c1_72 = arith.constant 1 : index
    %c0_73 = arith.constant 0 : index
    %c0_74 = arith.constant 0 : index
    %70 = vector.load %arg3[%c1_71, %c1_72, %c0_73, %c0_74] : memref<2x3x32x32xf32, #tpu.memory_space<vmem>>, vector<1x1x32x32xf32>
    %71 = vector.shape_cast %70 : vector<1x1x32x32xf32> to vector<32x32xf32>
    %c1_75 = arith.constant 1 : index
    %c2_76 = arith.constant 2 : index
    %c0_77 = arith.constant 0 : index
    %c0_78 = arith.constant 0 : index
    %72 = vector.load %arg3[%c1_75, %c2_76, %c0_77, %c0_78] : memref<2x3x32x32xf32, #tpu.memory_space<vmem>>, vector<1x1x32x32xf32>
    %73 = vector.shape_cast %72 : vector<1x1x32x32xf32> to vector<32x32xf32>
    %c1_79 = arith.constant 1 : index
    %c0_80 = arith.constant 0 : index
    %c0_81 = arith.constant 0 : index
    %c0_82 = arith.constant 0 : index
    %74 = vector.load %arg4[%c1_79, %c0_80, %c0_81, %c0_82] : memref<2x4x1x32xf32, #tpu.memory_space<vmem>>, vector<1x1x1x32xf32>
    %75 = vector.shape_cast %74 : vector<1x1x1x32xf32> to vector<1x32xf32>
    %c1_83 = arith.constant 1 : index
    %c1_84 = arith.constant 1 : index
    %c0_85 = arith.constant 0 : index
    %c0_86 = arith.constant 0 : index
    %76 = vector.load %arg4[%c1_83, %c1_84, %c0_85, %c0_86] : memref<2x4x1x32xf32, #tpu.memory_space<vmem>>, vector<1x1x1x32xf32>
    %77 = vector.shape_cast %76 : vector<1x1x1x32xf32> to vector<1x32xf32>
    %c1_87 = arith.constant 1 : index
    %c2_88 = arith.constant 2 : index
    %c0_89 = arith.constant 0 : index
    %c0_90 = arith.constant 0 : index
    %78 = vector.load %arg4[%c1_87, %c2_88, %c0_89, %c0_90] : memref<2x4x1x32xf32, #tpu.memory_space<vmem>>, vector<1x1x1x32xf32>
    %79 = vector.shape_cast %78 : vector<1x1x1x32xf32> to vector<1x32xf32>
    %c1_91 = arith.constant 1 : index
    %c3_92 = arith.constant 3 : index
    %c0_93 = arith.constant 0 : index
    %c0_94 = arith.constant 0 : index
    %80 = vector.load %arg4[%c1_91, %c3_92, %c0_93, %c0_94] : memref<2x4x1x32xf32, #tpu.memory_space<vmem>>, vector<1x1x1x32xf32>
    %81 = vector.shape_cast %80 : vector<1x1x1x32xf32> to vector<1x32xf32>
    %cst_95 = arith.constant dense<0.000000e+00> : vector<2x32xf32>
    %82 = tpu.matmul %56, %63, %cst_95 {dimension_numbers = #tpu.dot_dimension_numbers<[1], [0], [0], [1], [0, 0, 1, 1], [], []>} : vector<2x32xf32>, vector<32x32xf32>, vector<2x32xf32> -> vector<2x32xf32>
    %cst_96 = arith.constant dense<0.000000e+00> : vector<2x32xf32>
    %83 = tpu.matmul %56, %65, %cst_96 {dimension_numbers = #tpu.dot_dimension_numbers<[1], [0], [0], [1], [0, 0, 1, 1], [], []>} : vector<2x32xf32>, vector<32x32xf32>, vector<2x32xf32> -> vector<2x32xf32>
    %cst_97 = arith.constant dense<0.000000e+00> : vector<2x32xf32>
    %84 = tpu.matmul %56, %67, %cst_97 {dimension_numbers = #tpu.dot_dimension_numbers<[1], [0], [0], [1], [0, 0, 1, 1], [], []>} : vector<2x32xf32>, vector<32x32xf32>, vector<2x32xf32> -> vector<2x32xf32>
    %cst_98 = arith.constant dense<0.000000e+00> : vector<2x32xf32>
    %85 = tpu.matmul %61, %69, %cst_98 {dimension_numbers = #tpu.dot_dimension_numbers<[1], [0], [0], [1], [0, 0, 1, 1], [], []>} : vector<2x32xf32>, vector<32x32xf32>, vector<2x32xf32> -> vector<2x32xf32>
    %cst_99 = arith.constant dense<0.000000e+00> : vector<2x32xf32>
    %86 = tpu.matmul %61, %71, %cst_99 {dimension_numbers = #tpu.dot_dimension_numbers<[1], [0], [0], [1], [0, 0, 1, 1], [], []>} : vector<2x32xf32>, vector<32x32xf32>, vector<2x32xf32> -> vector<2x32xf32>
    %cst_100 = arith.constant dense<0.000000e+00> : vector<2x32xf32>
    %87 = tpu.matmul %61, %73, %cst_100 {dimension_numbers = #tpu.dot_dimension_numbers<[1], [0], [0], [1], [0, 0, 1, 1], [], []>} : vector<2x32xf32>, vector<32x32xf32>, vector<2x32xf32> -> vector<2x32xf32>
    %88 = arith.addf %82, %85 : vector<2x32xf32>
    %89 = vector.broadcast %75 : vector<1x32xf32> to vector<2x32xf32>
    %90 = arith.addf %88, %89 : vector<2x32xf32>
    %91 = arith.negf %90 : vector<2x32xf32>
    %92 = math.exp %91 : vector<2x32xf32>
    %cst_101 = arith.constant 1.000000e+00 : f32
    %93 = vector.broadcast %cst_101 : f32 to vector<2x32xf32>
    %94 = arith.addf %93, %92 : vector<2x32xf32>
    %95 = arith.divf %93, %94 : vector<2x32xf32>
    %96 = arith.addf %83, %86 : vector<2x32xf32>
    %97 = vector.broadcast %77 : vector<1x32xf32> to vector<2x32xf32>
    %98 = arith.addf %96, %97 : vector<2x32xf32>
    %99 = arith.negf %98 : vector<2x32xf32>
    %100 = math.exp %99 : vector<2x32xf32>
    %cst_102 = arith.constant 1.000000e+00 : f32
    %101 = vector.broadcast %cst_102 : f32 to vector<2x32xf32>
    %102 = arith.addf %101, %100 : vector<2x32xf32>
    %103 = arith.divf %101, %102 : vector<2x32xf32>
    %104 = vector.broadcast %79 : vector<1x32xf32> to vector<2x32xf32>
    %105 = arith.addf %84, %104 : vector<2x32xf32>
    %106 = vector.broadcast %81 : vector<1x32xf32> to vector<2x32xf32>
    %107 = arith.addf %87, %106 : vector<2x32xf32>
    %108 = arith.mulf %95, %107 : vector<2x32xf32>
    %109 = arith.addf %105, %108 : vector<2x32xf32>
    %110 = math.tanh %109 : vector<2x32xf32>
    %cst_103 = arith.constant 1.000000e+00 : f32
    %111 = vector.broadcast %cst_103 : f32 to vector<2x32xf32>
    %112 = arith.subf %111, %103 : vector<2x32xf32>
    %113 = arith.mulf %112, %110 : vector<2x32xf32>
    %114 = arith.mulf %103, %61 : vector<2x32xf32>
    %115 = arith.addf %113, %114 : vector<2x32xf32>
    %c1_104 = arith.constant 1 : index
    %c0_105 = arith.constant 0 : index
    %c0_106 = arith.constant 0 : index
    %116 = vector.load %arg5[%c1_104, %c0_105, %c0_106] : memref<2x2x32xf32, #tpu.memory_space<vmem>>, vector<1x2x32xf32>
    %117 = vector.shape_cast %116 : vector<1x2x32xf32> to vector<2x32xf32>
    %118 = vector.shape_cast %115 : vector<2x32xf32> to vector<1x2x32xf32>
    tpu.vector_store %arg5[%c1_104, %c0_105, %c0_106], %118 {strides = array<i32>} : memref<2x2x32xf32, #tpu.memory_space<vmem>>, vector<1x2x32xf32>,
    return
  }
}

</mosaic_0001>

<bundles_post_ra>
// kernel: stacked_gru_cell.1
= control target key start
LH: loop header
LB: loop body
LE: loop exit
PB: predicated region body
PF: predicated region fallthrough
CT: control target
= control target key end

     0   :  { %v1335_v0 = vmov 0.0   ;;  %vm1336_vm0 = vmmov 0   ;;  %vm57_vm1 = vcmask 261120   ;;  %vm529_vm2 = vcmask 254976   ;;  %s1648_s3 = inlined_call_operand.vmem [shape: f32[2,3,32,32], index: 3, kind: input, shape index: {}]   ;;  %s1649_s1 = inlined_call_operand.vmem [shape: f32[2,2,32], index: 1, kind: input, shape index: {}]   ;;  %s1650_s2 = inlined_call_operand.vmem [shape: f32[2,3,32,32], index: 2, kind: input, shape index: {}]   ;;  %s1651_s0 = inlined_call_operand.vmem [shape: f32[2,32], index: 0, kind: input, shape index: {}]   ;;  %s1652_s4 = inlined_call_operand.vmem [shape: f32[2,4,1,32], index: 4, kind: input, shape index: {}]   ;;  %s1653_s5 = inlined_call_operand.vmem [shape: f32[2,2,32], index: 5, kind: output, shape index: {}]  }
   0x1   :  { %1181 = vmatprep.subr.mxu0 %v1335_v0  ;;  %v39_v1 = vld [vmem:[%s1648_s3 + $0x18] sm:$0xff]  ;;  %v38_v2 = vld [vmem:[%s1648_s3 + $0x10] sm:$0xff]  ;;  %1189 = vmatprep.mubr.msk.f32.mxu0 %vm1336_vm0, %v1335_v0  ;;  %v37_v3 = vld [vmem:[%s1648_s3 + $0x8] sm:$0xff] }
   0x2   :  { %1182 = vmatpush3.msra.mxu0 %v39_v1  ;;  %1192 = vmatprep.subr.mxu1 %v1335_v0  ;;  %v1059_v4 = vld [vmem:[%s1648_s3 + $0x38] sm:$0xff]  ;;  %v1058_v5 = vld [vmem:[%s1648_s3 + $0x30] sm:$0xff]  ;;  %v36_v6 = vld [vmem:[%s1648_s3] sm:$0xff] }
   0x3   :  { %1183 = vmatprep.subr.mxu0 %v1335_v0  ;;  %1200 = vmatprep.mubr.msk.f32.mxu1 %vm1336_vm0, %v1335_v0  ;;  %v1057_v7 = vld [vmem:[%s1648_s3 + $0x28] sm:$0xff]  ;;  %v1400_v8 = vld [vmem:[%s1649_s1] sm:$0x3]  ;;  %v25_v9 = vld [vmem:[%s1650_s2 + $0x18] sm:$0xff] }
   0x4   :  { %1184 = vmatpush3.msra.mxu0 %v38_v2  ;;  %1193 = vmatpush3.msra.mxu1 %v1059_v4  ;;  %v24_v10 = vld [vmem:[%s1650_s2 + $0x10] sm:$0xff]  ;;  %v1056_v11 = vld [vmem:[%s1648_s3 + $0x20] sm:$0xff]  ;;  %v23_v12 = vld [vmem:[%s1650_s2 + $0x8] sm:$0xff] }
   0x5   :  { %1185 = vmatprep.subr.mxu0 %v1335_v0  ;;  %1194 = vmatprep.subr.mxu1 %v1335_v0  ;;  %v1051_v13 = vld [vmem:[%s1650_s2 + $0x38] sm:$0xff]  ;;  %v22_v14 = vld [vmem:[%s1650_s2] sm:$0xff]  ;;  %v1050_v16 = vld [vmem:[%s1650_s2 + $0x30] sm:$0xff] }
   0x6   :  { %1186 = vmatpush3.msra.mxu0 %v37_v3  ;;  %1195 = vmatpush3.msra.mxu1 %v1058_v5  ;;  %v20_v15 = vld [vmem:[%s1651_s0] sm:$0x3]  ;;  %v1049_v17 = vld [vmem:[%s1650_s2 + $0x28] sm:$0xff]  ;;  %v1055_v18 = vld [vmem:[%s1650_s2 + $0x58] sm:$0xff] }
   0x7   :  { %1187 = vmatprep.subr.mxu0 %v1335_v0  ;;  %1196 = vmatprep.subr.mxu1 %v1335_v0  ;;  %v1048_v19 = vld [vmem:[%s1650_s2 + $0x20] sm:$0xff]  ;;  %v1063_v20 = vld [vmem:[%s1648_s3 + $0x58] sm:$0xff]  ;;  %v1054_v21 = vld [vmem:[%s1650_s2 + $0x50] sm:$0xff] }
   0x8   :  { %1188 = vmatpush3.msra.mxu0 %v36_v6  ;;  %1197 = vmatpush3.msra.mxu1 %v1057_v7  ;;  %v1062_v22 = vld [vmem:[%s1648_s3 + $0x50] sm:$0xff]  ;;  %v1053_v23 = vld [vmem:[%s1650_s2 + $0x48] sm:$0xff]  ;;  %v1052_v25 = vld [vmem:[%s1650_s2 + $0x40] sm:$0xff] }
   0x9   :  { %1190 = vmatmul.mubr.msk.f32.vlgmr.msra.gmra.mxu0 %vm57_vm1, %v1400_v8  ;;  %1203 = vmatprep.subr.mxu0 %v1335_v0  ;;  %v1061_v24 = vld [vmem:[%s1648_s3 + $0x48] sm:$0xff]  ;;  %v1060_v26 = vld [vmem:[%s1648_s3 + $0x40] sm:$0xff]  ;;  %v1095_v27 = vld [vmem:[%s1648_s3 + $0x78] sm:$0xff] }
   0xa   :  { %1204 = vmatpush3.msra.mxu0 %v25_v9  ;;  %1198 = vmatprep.subr.mxu1 %v1335_v0  ;;  %v1099_v28 = vld [vmem:[%s1648_s3 + $0x98] sm:$0xff]  ;;  %v1094_v29 = vld [vmem:[%s1648_s3 + $0x70] sm:$0xff]  ;;  %v1093_v31 = vld [vmem:[%s1648_s3 + $0x68] sm:$0xff] }
   0xb   :  { %1205 = vmatprep.subr.mxu0 %v1335_v0  ;;  %1211 = vmatprep.mubr.msk.f32.mxu0 %vm1336_vm0, %v1335_v0  ;;  %v1098_v30 = vld [vmem:[%s1648_s3 + $0x90] sm:$0xff]  ;;  %v1097_v32 = vld [vmem:[%s1648_s3 + $0x88] sm:$0xff]  ;;  %v1092_v33 = vld [vmem:[%s1648_s3 + $0x60] sm:$0xff] }
   0xc   :  { %1206 = vmatpush3.msra.mxu0 %v24_v10  ;;  %1199 = vmatpush3.msra.mxu1 %v1056_v11  ;;  %v1096_v34 = vld [vmem:[%s1648_s3 + $0x80] sm:$0xff]  ;;  %v1083_v36 = vld [vmem:[%s1650_s2 + $0x78] sm:$0xff]  ;;  %v1082_v38 = vld [vmem:[%s1650_s2 + $0x70] sm:$0xff] }
   0xd   :  { %1207 = vmatprep.subr.mxu0 %v1335_v0  ;;  %1214 = vmatprep.subr.mxu1 %v1335_v0  ;;  %v1529_v35 = vld [vmem:[%s1649_s1 + $0x2] sm:$0x3]  ;;  %v1087_v37 = vld [vmem:[%s1650_s2 + $0x98] sm:$0xff]  ;;  %v1086_v39 = vld [vmem:[%s1650_s2 + $0x90] sm:$0xff] }
   0xe   :  { %1208 = vmatpush3.msra.mxu0 %v23_v12  ;;  %1201 = vmatmul.mubr.msk.f32.vlgmr.msra.gmra.mxu1 %vm57_vm1, %v1400_v8  ;;  %v1081_v40 = vld [vmem:[%s1650_s2 + $0x68] sm:$0xff]  ;;  %v1080_v42 = vld [vmem:[%s1650_s2 + $0x60] sm:$0xff] }
   0xf   :  { %1209 = vmatprep.subr.mxu0 %v1335_v0  ;;  %1215 = vmatpush3.msra.mxu1 %v1051_v13  ;;  %v1085_v41 = vld [vmem:[%s1650_s2 + $0x88] sm:$0xff]  ;;  %v1084_v43 = vld [vmem:[%s1650_s2 + $0x80] sm:$0xff] }
  0x10   :  { %1210 = vmatpush3.msra.mxu0 %v22_v14  ;;  %1216 = vmatprep.subr.mxu1 %v1335_v0  ;;  %v1070_v48 = vld [vmem:[%s1652_s4] ss:$0 sm:$0xff]  ;;  %v1073_v55 = vld [vmem:[%s1652_s4 + $0x1] ss:$0 sm:$0xff]  ;;  %v1077_v4 = vld [vmem:[%s1652_s4 + $0x3] ss:$0 sm:$0xff] }
  0x11   :  { %1212 = vmatmul.mubr.msk.f32.vlgmr.msra.gmra.mxu0 %vm57_vm1, %v20_v15  ;;  %1217 = vmatpush3.msra.mxu1 %v1050_v16  ;;  %v1075_v5 = vld [vmem:[%s1652_s4 + $0x2] ss:$0 sm:$0xff] }
  0x12   :  { %1218 = vmatprep.subr.mxu1 %v1335_v0  ;;  %1222 = vmatprep.mubr.msk.f32.mxu1 %vm1336_vm0, %v1335_v0 }
  0x13   :  { %1219 = vmatpush3.msra.mxu1 %v1049_v17  ;;  %1225 = vmatprep.subr.mxu0 %v1335_v0 }
  0x14   :  { %1220 = vmatprep.subr.mxu1 %v1335_v0  ;;  %1226 = vmatpush3.msra.mxu0 %v1055_v18 }
  0x15   :  { %1221 = vmatpush3.msra.mxu1 %v1048_v19  ;;  %1227 = vmatprep.subr.mxu0 %v1335_v0  ;;  %v1091_v19 = vld [vmem:[%s1650_s2 + $0xb8] sm:$0xff] }
  0x16   :  { %1223 = vmatmul.mubr.msk.f32.vlgmr.msra.gmra.mxu1 %vm57_vm1, %v20_v15  ;;  %1236 = vmatprep.subr.mxu1 %v1335_v0 }
  0x17   :  { %1237 = vmatpush3.msra.mxu1 %v1063_v20  ;;  %1228 = vmatpush3.msra.mxu0 %v1054_v21  ;;  %v1103_v20 = vld [vmem:[%s1648_s3 + $0xb8] sm:$0xff]  ;;  %v1102_v21 = vld [vmem:[%s1648_s3 + $0xb0] sm:$0xff] }
  0x18   :  { %1238 = vmatprep.subr.mxu1 %v1335_v0  ;;  %1229 = vmatprep.subr.mxu0 %v1335_v0 }
  0x19   :  { %1239 = vmatpush3.msra.mxu1 %v1062_v22  ;;  %1230 = vmatpush3.msra.mxu0 %v1053_v23  ;;  %v1089_v22 = vld [vmem:[%s1650_s2 + $0xa8] sm:$0xff] }
  0x1a   :  { %1240 = vmatprep.subr.mxu1 %v1335_v0  ;;  %1244 = vmatprep.mubr.msk.f32.mxu1 %vm1336_vm0, %v1335_v0  ;;  %v1101_v23 = vld [vmem:[%s1648_s3 + $0xa8] sm:$0xff] }
  0x1b   :  { %1241 = vmatpush3.msra.mxu1 %v1061_v24  ;;  %1231 = vmatprep.subr.mxu0 %v1335_v0  ;;  %v1088_v24 = vld [vmem:[%s1650_s2 + $0xa0] sm:$0xff] }
  0x1c   :  { %1242 = vmatprep.subr.mxu1 %v1335_v0  ;;  %1232 = vmatpush3.msra.mxu0 %v1052_v25  ;;  %v1100_v25 = vld [vmem:[%s1648_s3 + $0xa0] sm:$0xff] }
  0x1d   :  { %1243 = vmatpush3.msra.mxu1 %v1060_v26  ;;  %1233 = vmatprep.mubr.msk.f32.mxu0 %vm1336_vm0, %v1335_v0 }
  0x1e   :  { %1245 = vmatmul.mubr.msk.f32.vlgmr.msra.gmra.mxu1 %vm57_vm1, %v1400_v8  ;;  %1234 = vmatmul.mubr.msk.f32.vlgmr.msra.gmra.mxu0 %vm57_vm1, %v20_v15 }
  0x1f   :  { %1247 = vmatprep.subr.mxu0 %v1335_v0  ;;  %1258 = vmatprep.subr.mxu1 %v1335_v0 }
  0x20   :  { %1255 = vmatprep.mubr.msk.f32.mxu0 %vm1336_vm0, %v1335_v0  ;;  %1266 = vmatprep.mubr.msk.f32.mxu1 %vm1336_vm0, %v1335_v0 }
  0x21   :  { %1248 = vmatpush3.msra.mxu0 %v1095_v27  ;;  %1259 = vmatpush3.msra.mxu1 %v1099_v28 }
  0x22   :  { %1249 = vmatprep.subr.mxu0 %v1335_v0  ;;  %1260 = vmatprep.subr.mxu1 %v1335_v0 }
  0x23   :  { %1250 = vmatpush3.msra.mxu0 %v1094_v29  ;;  %1261 = vmatpush3.msra.mxu1 %v1098_v30  ;;  %v1111_v30 = vld [vmem:[%s1652_s4 + $0x4] ss:$0 sm:$0xff] }
  0x24   :  { %1251 = vmatprep.subr.mxu0 %v1335_v0  ;;  %1262 = vmatprep.subr.mxu1 %v1335_v0 }
  0x25   :  { %1252 = vmatpush3.msra.mxu0 %v1093_v31  ;;  %1263 = vmatpush3.msra.mxu1 %v1097_v32 }
  0x26   :  { %1253 = vmatprep.subr.mxu0 %v1335_v0  ;;  %1264 = vmatprep.subr.mxu1 %v1335_v0 }
  0x27   :  { %1254 = vmatpush3.msra.mxu0 %v1092_v33  ;;  %1265 = vmatpush3.msra.mxu1 %v1096_v34 }
  0x28   :  { %1256 = vmatmul.mubr.msk.f32.vlgmr.msra.gmra.mxu0 %vm57_vm1, %v1529_v35  ;;  %1269 = vmatprep.subr.mxu0 %v1335_v0 }
  0x29   :  { %1270 = vmatpush3.msra.mxu0 %v1083_v36  ;;  %1280 = vmatprep.subr.mxu1 %v1335_v0 }
  0x2a   :  { %1267 = vmatmul.mubr.msk.f32.vlgmr.msra.gmra.mxu1 %vm57_vm1, %v1529_v35  ;;  %1271 = vmatprep.subr.mxu0 %v1335_v0 }
  0x2b   :  { %1281 = vmatpush3.msra.mxu1 %v1087_v37  ;;  %1272 = vmatpush3.msra.mxu0 %v1082_v38 }
  0x2c   :  { %1282 = vmatprep.subr.mxu1 %v1335_v0  ;;  %1273 = vmatprep.subr.mxu0 %v1335_v0 }
  0x2d   :  { %1283 = vmatpush3.msra.mxu1 %v1086_v39  ;;  %1274 = vmatpush3.msra.mxu0 %v1081_v40 }
  0x2e   :  { %1284 = vmatprep.subr.mxu1 %v1335_v0  ;;  %1275 = vmatprep.subr.mxu0 %v1335_v0 }
  0x2f   :  { %1285 = vmatpush3.msra.mxu1 %v1085_v41  ;;  %1276 = vmatpush3.msra.mxu0 %v1080_v42 }
  0x30   :  { %1286 = vmatprep.subr.mxu1 %v1335_v0  ;;  %1277 = vmatprep.mubr.msk.f32.mxu0 %vm1336_vm0, %v1335_v0 }
  0x31   :  { %1287 = vmatpush3.msra.mxu1 %v1084_v43  ;;  %1288 = vmatprep.mubr.msk.f32.mxu1 %vm1336_vm0, %v1335_v0 }
  0x32   :  { %1291 = vmatprep.subr.mxu0 %v1335_v0  ;;  %1302 = vmatprep.subr.mxu1 %v1335_v0 }
  0xc9   :  { %v127_v44 = vpop.f32.mrf.mxu0 }
  0xcb   :  { %v1191_v45 = vpop.f32.mrf.mxu0 }
  0xce   :  { %v197_v46 = vpop.f32.mrf.mxu1 }
  0xd0   :  { %v1202_v47 = vpop.f32.mrf.mxu1 }
  0xd1   :  { %v270_v49 = vpop.f32.mrf.mxu0 }
  0xd2   :  { %v271_v50 = vadd.f32 %v270_v49, %v127_v44  ;;  %v1118_v49 = vld [vmem:[%s1652_s4 + $0x7] ss:$0 sm:$0xff] }
  0xd3   :  { %v1213_v51 = vpop.f32.mrf.mxu0 }
  0xd4   :  { %v280_v52 = vadd.f32 %v1070_v48, %v271_v50 }
  0xd6   :  { %v1071_v53 = vmul.f32 -1.442695, %v280_v52  ;;  %v353_v54 = vpop.f32.mrf.mxu1  ;;  %v1116_v52 = vld [vmem:[%s1652_s4 + $0x6] ss:$0 sm:$0xff] }
  0xd7   :  { %v354_v56 = vadd.f32 %v353_v54, %v197_v46 }
  0xd8   :  { %1315 = vpow2.f32 %v1071_v53  ;;  %v1224_v57 = vpop.f32.mrf.mxu1 }
  0xd9   :  { %v363_v58 = vadd.f32 %v1073_v55, %v354_v56 }
  0xdb   :  { %v1074_v59 = vmul.f32 -1.442695, %v363_v58 }
  0xdd   :  { %1317 = vpow2.f32 %v1074_v59 }
  0xde   :  { %v518_v60 = vpop.f32.mrf.mxu1  ;;  %v442_v61 = vpop.f32.mrf.mxu0 }
  0xdf   :  { %v519_v7 = vadd.f32 %v1077_v4, %v518_v60  ;;  %v443_v9 = vadd.f32 %v1075_v5, %v442_v61 }
  0xe0   :  { %v1246_v62 = vpop.f32.mrf.mxu1  ;;  %v1235_v63 = vpop.f32.mrf.mxu0 }
  0xe5   :  { %v1316_v1 = vpop.eup %1315 }
  0xe6   :  { %v284_v2 = vadd.f32 1.0, %v1316_v1 }
  0xe8   :  { %1319 = vrcp.f32 %v284_v2  ;;  %v640_v26 = vpop.f32.mrf.mxu0 }
  0xea   :  { %v1318_v3 = vpop.eup %1317  ;;  %v1257_v27 = vpop.f32.mrf.mxu0 }
  0xeb   :  { %v367_v6 = vadd.f32 1.0, %v1318_v3  ;;  %v710_v28 = vpop.f32.mrf.mxu1 }
  0xed   :  { %1321 = vrcp.f32 %v367_v6  ;;  %v1268_v29 = vpop.f32.mrf.mxu1 }
  0xf5   :  { %v1320_v10 = vpop.eup %1319 }
  0xf6   :  { %v522_v11 = vmul.f32 %v1320_v10, %v519_v7 }
  0xf8   :  { %v523_v12 = vadd.f32 %v522_v11, %v443_v9 }
  0xfa   :  { %1323 = vtanh.f32 %v523_v12  ;;  %v1322_v13 = vpop.eup %1321 }
  0xfb   :  { %v525_v14 = vsub.f32 1.0, %v1322_v13  ;;  %v527_v17 = vmul.f32 %v1322_v13, %v1400_v8  ;;  %v1090_v8 = vld [vmem:[%s1650_s2 + $0xb0] sm:$0xff] }
 0x107   :  { %v1324_v15 = vpop.eup %1323 }
 0x108   :  { %v526_v16 = vmul.f32 %v1324_v15, %v525_v14 }
 0x10a   :  { %v528_v18 = vadd.f32 %v527_v17, %v526_v16 }
 0x10c   :  { %530 = vst.msk [vmem:[%s1653_s5] sm:$0x3] %vm529_vm2, %v528_v18  ;;  %1278 = vmatmul.mubr.msk.f32.vlgmr.msra.gmra.mxu0 %vm57_vm1, %v528_v18  ;;  %1289 = vmatmul.mubr.msk.f32.vlgmr.msra.gmra.mxu1 %vm57_vm1, %v528_v18 }
 0x10d   :  { %1292 = vmatpush3.msra.mxu0 %v1091_v19  ;;  %1299 = vmatprep.mubr.msk.f32.mxu0 %vm1336_vm0, %v1335_v0 }
 0x10e   :  { %1293 = vmatprep.subr.mxu0 %v1335_v0  ;;  %1303 = vmatpush3.msra.mxu1 %v1103_v20 }
 0x10f   :  { %1294 = vmatpush3.msra.mxu0 %v1090_v8  ;;  %1304 = vmatprep.subr.mxu1 %v1335_v0 }
 0x110   :  { %1295 = vmatprep.subr.mxu0 %v1335_v0  ;;  %1305 = vmatpush3.msra.mxu1 %v1102_v21 }
 0x111   :  { %1296 = vmatpush3.msra.mxu0 %v1089_v22  ;;  %1306 = vmatprep.subr.mxu1 %v1335_v0 }
 0x112   :  { %1297 = vmatprep.subr.mxu0 %v1335_v0  ;;  %1307 = vmatpush3.msra.mxu1 %v1101_v23 }
 0x113   :  { %1298 = vmatpush3.msra.mxu0 %v1088_v24  ;;  %1308 = vmatprep.subr.mxu1 %v1335_v0 }
 0x114   :  { %1300 = vmatmul.mubr.msk.f32.vlgmr.msra.gmra.mxu0 %vm57_vm1, %v528_v18  ;;  %1309 = vmatpush3.msra.mxu1 %v1100_v25 }
 0x115   :  { %1310 = vmatprep.mubr.msk.f32.mxu1 %vm1336_vm0, %v1335_v0  ;;  %v1114_v0 = vld [vmem:[%s1652_s4 + $0x5] ss:$0 sm:$0xff] }
 0x116   :  { %1311 = vmatmul.mubr.msk.f32.vlgmr.msra.gmra.mxu1 %vm57_vm1, %v1529_v35 }
 0x1cc   :  { %v783_v31 = vpop.f32.mrf.mxu0  ;;  %v866_v32 = vpop.f32.mrf.mxu1 }
 0x1cd   :  { %v784_v33 = vadd.f32 %v783_v31, %v640_v26  ;;  %v867_v39 = vadd.f32 %v866_v32, %v710_v28 }
 0x1ce   :  { %v1279_v34 = vpop.f32.mrf.mxu0  ;;  %v1290_v36 = vpop.f32.mrf.mxu1 }
 0x1cf   :  { %v793_v37 = vadd.f32 %v1111_v30, %v784_v33  ;;  %v876_v41 = vadd.f32 %v1114_v0, %v867_v39 }
 0x1d1   :  { %v1112_v38 = vmul.f32 -1.442695, %v793_v37  ;;  %v1115_v45 = vmul.f32 -1.442695, %v876_v41 }
 0x1d3   :  { %1325 = vpow2.f32 %v1112_v38 }
 0x1d4   :  { %v955_v40 = vpop.f32.mrf.mxu0  ;;  %1327 = vpow2.f32 %v1115_v45 }
 0x1d5   :  { %v956_v54 = vadd.f32 %v1116_v52, %v955_v40 }
 0x1d6   :  { %v1301_v42 = vpop.f32.mrf.mxu0  ;;  %v1031_v43 = vpop.f32.mrf.mxu1 }
 0x1d7   :  { %v1032_v51 = vadd.f32 %v1118_v49, %v1031_v43 }
 0x1d8   :  { %v1312_v44 = vpop.f32.mrf.mxu1 }
 0x1e0   :  { %v1326_v46 = vpop.eup %1325 }
 0x1e1   :  { %v797_v47 = vadd.f32 1.0, %v1326_v46  ;;  %v1328_v48 = vpop.eup %1327 }
 0x1e2   :  { %v880_v50 = vadd.f32 1.0, %v1328_v48 }
 0x1e3   :  { %1329 = vrcp.f32 %v797_v47 }
 0x1e4   :  { %1331 = vrcp.f32 %v880_v50 }
 0x1f0   :  { %v1330_v53 = vpop.eup %1329 }
 0x1f1   :  { %v1035_v55 = vmul.f32 %v1330_v53, %v1032_v51  ;;  %v1332_v57 = vpop.eup %1331 }
 0x1f2   :  { %v1038_v58 = vsub.f32 1.0, %v1332_v57  ;;  %v1040_v60 = vmul.f32 %v1332_v57, %v1529_v35 }
 0x1f3   :  { %v1036_v56 = vadd.f32 %v1035_v55, %v956_v54 }
 0x1f5   :  { %1333 = vtanh.f32 %v1036_v56 }
 0x202   :  { %v1334_v59 = vpop.eup %1333 }
 0x203   :  { %v1039_v61 = vmul.f32 %v1334_v59, %v1038_v58 }
 0x205   :  { %v1041_v62 = vadd.f32 %v1040_v60, %v1039_v61 }
 0x207   :  { %1120 = vst.msk [vmem:[%s1653_s5 + $0x2] sm:$0x3] %vm529_vm2, %v1041_v62 }

</bundles_post_ra>
